<compile_context>
chip_gen: v7x
topology: tpu7x:2x2x1
jax: 0.10.0
libtpu: 0.0.40
codegen_flags: <defaults>
</compile_context>

<pallas_src>
import functools

import jax
import jax.numpy as jnp
from jax import lax
from jax.experimental import pallas as pl
from jax.experimental.pallas import tpu as pltpu


def _round_up(x, m):
    return ((x + m - 1) // m) * m


def _linear_kernel(x_ref, w_ref, b_ref, o_ref):
    # x_ref: (TM, F), w_ref: (C_pad, F) [torch layout], b_ref: (1, C_pad)
    # Contract on the last dim of both operands (MXU-native form), f32 accumulation.
    acc = lax.dot_general(
        x_ref[...],
        w_ref[...],
        dimension_numbers=(((1,), (1,)), ((), ())),
        preferred_element_type=jnp.float32,
    )
    o_ref[...] = (acc + b_ref[...]).astype(o_ref.dtype)


@functools.partial(jax.jit, static_argnames=("tile_m",))
def logistic_regression_forward(x, weight, bias, *, tile_m=512):
    """Pallas equivalent of nn.Linear(n_features, n_classes)(x).

    Args:
      x:      (B, n_features) float32
      weight: (n_classes, n_features) float32  (torch layout, no transpose needed)
      bias:   (n_classes,) float32
    Returns:
      (B, n_classes) float32 logits (same semantics as the torch forward).
    """
    B, F = x.shape
    C = weight.shape[0]

    # --- pad class dim to a multiple of 128 for lane-dense output stores ---
    C_pad = _round_up(max(C, 128), 128)
    w_p = jnp.pad(weight, ((0, C_pad - C), (0, 0)))          # (C_pad, F)
    b_p = jnp.pad(bias, (0, C_pad - C)).reshape(1, C_pad)    # (1, C_pad)

    # --- choose batch tile: multiple of 8, capped by B, sized to fit scoped VMEM ---
    TM = min(tile_m, _round_up(B, 8))
    TM = _round_up(TM, 8)

    def vmem_bytes(tm):
        # 2 buffers each for x-tile and out-tile + resident weight/bias (double counted
        # conservatively for the pipeline's buffer allocation).
        return 4 * (2 * tm * F + 2 * C_pad * F + 2 * tm * C_pad + 2 * C_pad)

    budget = 24 * 1024 * 1024  # stay under the 32 MiB scoped-VMEM default everywhere
    while TM > 8 and vmem_bytes(TM) > budget:
        TM = max(8, TM // 2)

    # --- pad batch so the grid divides evenly ---
    B_pad = _round_up(B, TM)
    x_p = x if B_pad == B else jnp.pad(x, ((0, B_pad - B), (0, 0)))

    grid = (B_pad // TM,)

    cost = pl.CostEstimate(
        flops=2 * B_pad * F * C_pad,
        transcendentals=0,
        bytes_accessed=4 * (B_pad * F + C_pad * F + C_pad + B_pad * C_pad),
    )

    out = pl.pallas_call(
        _linear_kernel,
        out_shape=jax.ShapeDtypeStruct((B_pad, C_pad), x.dtype),
        grid_spec=pltpu.PrefetchScalarGridSpec(
            num_scalar_prefetch=0,
            grid=grid,
            in_specs=[
                pl.BlockSpec((TM, F), lambda i: (i, 0)),        # x tile, streamed over batch
                pl.BlockSpec((C_pad, F), lambda i: (0, 0)),     # weight, VMEM-resident
                pl.BlockSpec((1, C_pad), lambda i: (0, 0)),     # bias, VMEM-resident
            ],
            out_specs=pl.BlockSpec((TM, C_pad), lambda i: (i, 0)),
        ),
        compiler_params=pltpu.CompilerParams(
            dimension_semantics=("parallel",),                  # megacore sharding on v7x
        ),
        cost_estimate=cost,
    )(x_p, w_p, b_p)

    # Slice away batch + class padding.
    return out[:B, :C]


if __name__ == "__main__":
    # Small shapes consistent with LogisticRegression(n_features, n_classes).
    batch, n_features, n_classes = 16, 32, 8

    key = jax.random.PRNGKey(0)
    kx, kw, kb = jax.random.split(key, 3)

    x = jax.random.normal(kx, (batch, n_features), dtype=jnp.float32)
    # torch nn.Linear parameter shapes: W (out, in), b (out,)
    bound = 1.0 / (n_features ** 0.5)
    weight = jax.random.uniform(kw, (n_classes, n_features),
                                minval=-bound, maxval=bound, dtype=jnp.float32)
    bias = jax.random.uniform(kb, (n_classes,),
                              minval=-bound, maxval=bound, dtype=jnp.float32)

    out = logistic_regression_forward(x, weight, bias)
    jax.block_until_ready(out)

    # Sanity check against plain-JAX reference (x @ W.T + b).
    ref = x @ weight.T + bias
    assert out.shape == (batch, n_classes)
    assert jnp.allclose(out, ref, atol=1e-5, rtol=1e-5)

    print("KERNEL_OK")
</pallas_src>

<mosaic_0001>
module attributes {stable_mosaic.version = 11 : i64} {
  func.func @_linear_kernel(%arg0: i32, %arg1: memref<16x32xf32, #tpu.memory_space<vmem>>, %arg2: memref<128x32xf32, #tpu.memory_space<vmem>>, %arg3: memref<1x128xf32, #tpu.memory_space<vmem>>, %arg4: memref<16x128xf32, #tpu.memory_space<vmem>>) attributes {dimension_semantics = [#tpu.dimension_semantics<parallel>], iteration_bounds = array<i64: 1>, scalar_prefetch = 0 : i64, scratch_operands = 0 : i64, tpu.core_type = #tpu.core_type<tc>, window_params = [{transform_indices = @transform_0, window_bounds = array<i64: 16, 32>}, {pipeline_mode = #tpu.pipeline_mode<synchronous>, transform_indices = @transform_1, window_bounds = array<i64: 128, 32>}, {pipeline_mode = #tpu.pipeline_mode<synchronous>, transform_indices = @transform_2, window_bounds = array<i64: 1, 128>}, {transform_indices = @transform_3, window_bounds = array<i64: 16, 128>}]} {
    %c0 = arith.constant 0 : index
    %c0_0 = arith.constant 0 : index
    %0 = vector.load %arg1[%c0, %c0_0] : memref<16x32xf32, #tpu.memory_space<vmem>>, vector<16x32xf32>
    %c0_1 = arith.constant 0 : index
    %c0_2 = arith.constant 0 : index
    %1 = vector.load %arg2[%c0_1, %c0_2] : memref<128x32xf32, #tpu.memory_space<vmem>>, vector<128x32xf32>
    %cst = arith.constant dense<0.000000e+00> : vector<16x128xf32>
    %2 = tpu.matmul %0, %1, %cst {dimension_numbers = #tpu.dot_dimension_numbers<[1], [1], [0], [0], [0, 0, 1, 0], [], []>} : vector<16x32xf32>, vector<128x32xf32>, vector<16x128xf32> -> vector<16x128xf32>
    %c0_3 = arith.constant 0 : index
    %c0_4 = arith.constant 0 : index
    %3 = vector.load %arg3[%c0_3, %c0_4] : memref<1x128xf32, #tpu.memory_space<vmem>>, vector<1x128xf32>
    %4 = vector.broadcast %3 : vector<1x128xf32> to vector<16x128xf32>
    %5 = arith.addf %2, %4 : vector<16x128xf32>
    %c0_5 = arith.constant 0 : index
    %c0_6 = arith.constant 0 : index
    %6 = vector.load %arg4[%c0_5, %c0_6] : memref<16x128xf32, #tpu.memory_space<vmem>>, vector<16x128xf32>
    tpu.vector_store %arg4[%c0_5, %c0_6], %5 {strides = array<i32>} : memref<16x128xf32, #tpu.memory_space<vmem>>, vector<16x128xf32>,
    return
  }
  func.func @transform_0(%arg0: i32) -> (i32, i32) {
    %c0_i32 = arith.constant 0 : i32
    %c0_i32_0 = arith.constant 0 : i32
    return %arg0, %c0_i32 : i32, i32
  }
  func.func @transform_1(%arg0: i32) -> (i32, i32) {
    %c0_i32 = arith.constant 0 : i32
    %c0_i32_0 = arith.constant 0 : i32
    %c0_i32_1 = arith.constant 0 : i32
    return %c0_i32, %c0_i32_0 : i32, i32
  }
  func.func @transform_2(%arg0: i32) -> (i32, i32) {
    %c0_i32 = arith.constant 0 : i32
    %c0_i32_0 = arith.constant 0 : i32
    %c0_i32_1 = arith.constant 0 : i32
    return %c0_i32, %c0_i32_0 : i32, i32
  }
  func.func @transform_3(%arg0: i32) -> (i32, i32) {
    %c0_i32 = arith.constant 0 : i32
    %c0_i32_0 = arith.constant 0 : i32
    return %arg0, %c0_i32 : i32, i32
  }
}

</mosaic_0001>

<bundles_post_ra>
// kernel: logistic_regression_forward.1
= control target key start
LH: loop header
LB: loop body
LE: loop exit
PB: predicated region body
PF: predicated region fallthrough
CT: control target
= control target key end

     0   :  { %vm39_vm0 = vcmask 261120   ;;  %s418_s1 = inlined_call_operand.vmem [shape: f32[128,32], index: 1, kind: input, shape index: {}]   ;;  %s419_s0 = inlined_call_operand.vmem [shape: f32[16,32], index: 0, kind: input, shape index: {}]   ;;  %s420_s2 = inlined_call_operand.vmem [shape: f32[1,128], index: 2, kind: input, shape index: {}]   ;;  %s421_s3 = inlined_call_operand.vmem [shape: f32[16,128], index: 3, kind: output, shape index: {}]  }
   0x1   :  { %v16_v0 = vld [vmem:[%s418_s1] sm:$0xff]  ;;  %v17_v1 = vld [vmem:[%s418_s1 + $0x8] sm:$0xff]  ;;  %vm323_vm1 = vmpackc.low %vm39_vm0, %vm39_vm0 }
   0x2   :  { %v247_v3 = vpack.c.bf16 %v17_v1, %v16_v0  ;;  %v18_v4 = vld [vmem:[%s418_s1 + $0x10] sm:$0xff]  ;;  %v19_v5 = vld [vmem:[%s418_s1 + $0x18] sm:$0xff]  ;;  %v14_v7 = vld [vmem:[%s419_s0] sm:$0xff] }
   0x3   :  { %v253_v6 = vpack.c.bf16 %v19_v5, %v18_v4  ;;  %v20_v8 = vld [vmem:[%s418_s1 + $0x20] sm:$0xff]  ;;  %v21_v9 = vld [vmem:[%s418_s1 + $0x28] sm:$0xff]  ;;  %244 = vmatprep.mubr.msk.f32.mxu0 %vm39_vm0, %v14_v7  ;;  %v22_v11 = vld [vmem:[%s418_s1 + $0x30] sm:$0xff] }
   0x4   :  { %249 = vmatprep.subr.msk.bf16.mxu0 %vm323_vm1, %v247_v3  ;;  %v259_v10 = vpack.c.bf16 %v21_v9, %v20_v8  ;;  %v23_v12 = vld [vmem:[%s418_s1 + $0x38] sm:$0xff]  ;;  %v24_v14 = vld [vmem:[%s418_s1 + $0x40] sm:$0xff]  ;;  %v25_v15 = vld [vmem:[%s418_s1 + $0x48] sm:$0xff] }
   0x5   :  { %252 = vmatpush3.bf16.xpose.msk.msra.mxu0 %vm323_vm1, %v247_v3  ;;  %v265_v13 = vpack.c.bf16 %v23_v12, %v22_v11  ;;  %v271_v16 = vpack.c.bf16 %v25_v15, %v24_v14  ;;  %v26_v17 = vld [vmem:[%s418_s1 + $0x50] sm:$0xff]  ;;  %v27_v18 = vld [vmem:[%s418_s1 + $0x58] sm:$0xff]  ;;  %v28_v20 = vld [vmem:[%s418_s1 + $0x60] sm:$0xff] }
   0x6   :  { %255 = vmatprep.subr.msk.bf16.mxu0 %vm323_vm1, %v253_v6  ;;  %v277_v19 = vpack.c.bf16 %v27_v18, %v26_v17  ;;  %v29_v21 = vld [vmem:[%s418_s1 + $0x68] sm:$0xff]  ;;  %v30_v23 = vld [vmem:[%s418_s1 + $0x70] sm:$0xff]  ;;  %v31_v24 = vld [vmem:[%s418_s1 + $0x78] sm:$0xff] }
   0x7   :  { %v283_v22 = vpack.c.bf16 %v29_v21, %v28_v20  ;;  %v289_v25 = vpack.c.bf16 %v31_v24, %v30_v23  ;;  %v15_v26 = vld [vmem:[%s419_s0 + $0x8] sm:$0xff]  ;;  %v175_v27 = vld [vmem:[%s420_s2] ss:$0 sm:$0xff] }
   0xd   :  { %258 = vmatpush3.bf16.xpose.msk.msra.mxu0 %vm323_vm1, %v253_v6 }
   0xe   :  { %261 = vmatprep.subr.msk.bf16.mxu0 %vm323_vm1, %v259_v10 }
  0x15   :  { %264 = vmatpush3.bf16.xpose.msk.msra.mxu0 %vm323_vm1, %v259_v10 }
  0x16   :  { %267 = vmatprep.subr.msk.bf16.mxu0 %vm323_vm1, %v265_v13 }
  0x1d   :  { %270 = vmatpush3.bf16.xpose.msk.msra.mxu0 %vm323_vm1, %v265_v13 }
  0x1e   :  { %273 = vmatprep.subr.msk.bf16.mxu0 %vm323_vm1, %v271_v16 }
  0x25   :  { %276 = vmatpush3.bf16.xpose.msk.msra.mxu0 %vm323_vm1, %v271_v16 }
  0x26   :  { %279 = vmatprep.subr.msk.bf16.mxu0 %vm323_vm1, %v277_v19 }
  0x2d   :  { %282 = vmatpush3.bf16.xpose.msk.msra.mxu0 %vm323_vm1, %v277_v19 }
  0x2e   :  { %285 = vmatprep.subr.msk.bf16.mxu0 %vm323_vm1, %v283_v22 }
  0x35   :  { %288 = vmatpush3.bf16.xpose.msk.msra.mxu0 %vm323_vm1, %v283_v22 }
  0x36   :  { %291 = vmatprep.subr.msk.bf16.mxu0 %vm323_vm1, %v289_v25 }
  0x3d   :  { %294 = vmatpush3.bf16.xpose.msk.msra.mxu0 %vm323_vm1, %v289_v25 }
  0x44   :  { %245 = vmatmul.mubr.msk.f32.vlgmr.msra.gmra.mrb[0].mxu0 %vm39_vm0, %v15_v26 }
 0x117   :  { %v246_v28 = vpop.f32.mrb[0].mxu0 }
 0x118   :  { %v166_v29 = vadd.f32 %v246_v28, %v175_v27  ;;  %v160_v30 = vpop.f32.mrb[1].mxu0 }
 0x119   :  { %v161_v31 = vadd.f32 %v175_v27, %v160_v30 }
 0x11a   :  { %170 = vst [vmem:[%s421_s3 + $0x8] sm:$0xff] %v166_v29 }
 0x11b   :  { %169 = vst [vmem:[%s421_s3] sm:$0xff] %v161_v31 }

</bundles_post_ra>
